<compile_context>
chip_gen: v7x
topology: tpu7x:2x2x1
jax: 0.10.0
libtpu: 0.0.40
codegen_flags: <defaults>
</compile_context>

<pallas_src>
import functools
import math

import jax
import jax.numpy as jnp
from jax.experimental import pallas as pl
from jax.experimental.pallas import tpu as pltpu


def _round_up(x, m):
    return (x + m - 1) // m * m


def _cdiv(a, b):
    return (a + b - 1) // b


# ---------------------------------------------------------------------------
# Kernel
# ---------------------------------------------------------------------------
def mlp_kernel(x_ref, w1_ref, b1_ref, w2_ref, b2_ref, w3_ref, b3_ref, o_ref,
               *, out_size):
    # x arrives as f32; cast to bf16 in-kernel (VPU op, hidden under the HBM bound).
    x = x_ref[...].astype(w1_ref.dtype)

    # Hidden layer 1: Linear (eval-BN folded into w1/b1) + ReLU, f32 accumulate/epilogue.
    h = jnp.dot(x, w1_ref[...], preferred_element_type=jnp.float32)
    h = jnp.maximum(h + b1_ref[...], 0.0)

    # Hidden layer 2: Linear (eval-BN folded into w2/b2) + ReLU.
    h = jnp.dot(h.astype(w2_ref.dtype), w2_ref[...],
                preferred_element_type=jnp.float32)
    h = jnp.maximum(h + b2_ref[...], 0.0)

    # Output layer, computed transposed:
    #   w3 (out_pad, K) . h (blk, K)  contracted on K  ->  (out_pad, blk)
    # so the store is lane-dense over the batch and only real columns are written.
    o_t = jax.lax.dot_general(
        w3_ref[...], h.astype(w3_ref.dtype),
        dimension_numbers=(((1,), (1,)), ((), ())),
        preferred_element_type=jnp.float32)
    o_ref[...] = (o_t[:out_size, :] + b3_ref[...]).astype(o_ref.dtype)


# ---------------------------------------------------------------------------
# Wrapper
# ---------------------------------------------------------------------------
def _choose_block_n(n, requested):
    # Small batch (or explicit big tile): one exact-size block — block dims equal
    # the full array dims, so the (8,128) divisibility rule is trivially satisfied.
    if requested >= n or n <= 128:
        return n
    # Multi-step: tile must be a multiple of 128 so the transposed output stores
    # stay lane-dense/unmasked; cap so the grid has >= 2 steps (v7x: both TCs).
    blk = min(requested, _round_up(_cdiv(n, 2), 128))
    return max(128, (blk // 128) * 128)


def mlp_forward(x, params, out_size, *, block_n=2048):
    """x: (N, input_size) f32.  params: packed params from pack_params.

    Returns (N, out_size) f32.
    """
    w1, b1, w2, b2, w3, b3 = params
    n, f = x.shape
    blk = _choose_block_n(n, block_n)
    grid = (_cdiv(n, blk),)

    def resident(shape):  # constant index_map -> fetched once, VMEM-resident
        return pl.BlockSpec(shape, lambda i: (0,) * len(shape))

    out_t = pl.pallas_call(
        functools.partial(mlp_kernel, out_size=out_size),
        out_shape=jax.ShapeDtypeStruct((out_size, n), jnp.float32),
        grid=grid,
        in_specs=[
            pl.BlockSpec((blk, f), lambda i: (i, 0)),   # x: tiled over batch, f32
            resident(w1.shape), resident(b1.shape),
            resident(w2.shape), resident(b2.shape),
            resident(w3.shape), resident(b3.shape),
        ],
        out_specs=pl.BlockSpec((out_size, blk), lambda i: (0, i)),
        compiler_params=pltpu.CompilerParams(
            dimension_semantics=("parallel",),       # megacore-friendly batch axis
            vmem_limit_bytes=32 * 1024 * 1024,       # fits v5e/v6e/v7x (64 MiB) easily
        ),
    )(x, w1, b1, w2, b2, w3, b3)
    return out_t.T                                    # (N, out_size); tiny transpose


# ---------------------------------------------------------------------------
# Parameter init (matches the PyTorch module) and eval-BN folding / packing
# ---------------------------------------------------------------------------
def _kaiming_uniform(key, fan_out, fan_in):
    # nn.init.kaiming_uniform_(w, nonlinearity='relu'): bound = sqrt(6 / fan_in)
    bound = math.sqrt(6.0 / fan_in)
    return jax.random.uniform(key, (fan_out, fan_in), jnp.float32, -bound, bound)


def _linear_bias(key, fan_in, fan_out):
    # torch.nn.Linear default bias init: U(-1/sqrt(fan_in), 1/sqrt(fan_in))
    bound = 1.0 / math.sqrt(fan_in)
    return jax.random.uniform(key, (fan_out,), jnp.float32, -bound, bound)


def init_raw_params(key, input_size, hidden_sizes, output_size):
    """Raw per-Linear (W (out,in), b (out,)) f32 params, PyTorch-equivalent init."""
    sizes = [input_size] + list(hidden_sizes) + [output_size]
    keys = jax.random.split(key, 2 * (len(sizes) - 1))
    return [(_kaiming_uniform(keys[2 * i], sizes[i + 1], sizes[i]),
             _linear_bias(keys[2 * i + 1], sizes[i], sizes[i + 1]))
            for i in range(len(sizes) - 1)]


def fold_bn_eval(w, b, gamma, beta, running_mean, running_var, eps):
    """Fold eval-mode BatchNorm1d into the preceding Linear (PyTorch (out,in) layout)."""
    scale = gamma / jnp.sqrt(running_var + eps)
    return w * scale[:, None], b * scale + (beta - running_mean * scale)


def pack_params(raw_params, *, bn_params=None, bn_eps=1e-5,
                compute_dtype=jnp.bfloat16):
    """Fold eval-BN, pad features to 128 lanes, pre-transpose hidden weights, cast.

    Returns (w1, b1, w2, b2, w3, b3):
      hidden:  w_i (K_prev, 128k) bf16 pre-transposed for x @ W, b_i (1, 128k) f32
      output:  w3  (round_up(out,8), K_last) bf16 (PyTorch (out,in) layout, row-padded),
               b3  (out, 1) f32  -> kernel produces a transposed (out, N) result.
    """
    n_layers = len(raw_params)
    packed = []
    k_width = raw_params[0][0].shape[1]          # first matmul K = real input_size
    for i, (w, b) in enumerate(raw_params):
        fan_out, fan_in = w.shape
        if i < n_layers - 1:
            if bn_params is not None:
                g, beta, rm, rv = bn_params[i]
            else:                                 # fresh module: identity statistics
                g = jnp.ones((fan_out,), jnp.float32)
                beta = jnp.zeros((fan_out,), jnp.float32)
                rm = jnp.zeros((fan_out,), jnp.float32)
                rv = jnp.ones((fan_out,), jnp.float32)
            w, b = fold_bn_eval(w, b, g, beta, rm, rv, bn_eps)
            out_pad = _round_up(fan_out, 128)
            w_pad = jnp.zeros((k_width, out_pad), jnp.float32)
            w_pad = w_pad.at[:fan_in, :fan_out].set(w.T)
            b_pad = jnp.zeros((1, out_pad), jnp.float32).at[0, :fan_out].set(b)
            packed += [w_pad.astype(compute_dtype), b_pad]
            k_width = out_pad
        else:
            row_pad = _round_up(fan_out, 8)
            w_pad = jnp.zeros((row_pad, k_width), jnp.float32)
            w_pad = w_pad.at[:fan_out, :fan_in].set(w)
            packed += [w_pad.astype(compute_dtype),
                       b.reshape(fan_out, 1).astype(jnp.float32)]
    return tuple(packed)


# ---------------------------------------------------------------------------
# References
# ---------------------------------------------------------------------------
def mlp_reference_f32(x, raw_params, bn_eps=1e-5):
    """Full-f32 reference: Linear -> BN(eval, identity stats) -> ReLU ..., final Linear."""
    *hidden, (w_out, b_out) = raw_params
    h = x
    for (w, b) in hidden:
        h = h @ w.T + b
        h = h / jnp.sqrt(1.0 + bn_eps)            # eval BN with rm=0, rv=1, g=1, beta=0
        h = jnp.maximum(h, 0.0)
    return h @ w_out.T + b_out


def mlp_reference_folded(x, params, out_size):
    """Pure-JAX reference using the same folded/padded/bf16 params as the kernel."""
    w1, b1, w2, b2, w3, b3 = params
    xb = x.astype(w1.dtype)
    h = jnp.maximum(jnp.dot(xb, w1, preferred_element_type=jnp.float32) + b1, 0.0)
    h = jnp.maximum(jnp.dot(h.astype(w2.dtype), w2,
                            preferred_element_type=jnp.float32) + b2, 0.0)
    o_t = jax.lax.dot_general(w3, h.astype(w3.dtype),
                              dimension_numbers=(((1,), (1,)), ((), ())),
                              preferred_element_type=jnp.float32)
    return (o_t[:out_size] + b3).T


# ---------------------------------------------------------------------------
if __name__ == "__main__":
    # Small shapes consistent with the module (real use: 1280 -> [256,128] -> 1).
    input_size = 64
    hidden_sizes = [32, 16]
    output_size = 1
    dropout_prob = 0.5                            # inference mode: identity

    key = jax.random.PRNGKey(0)
    kx, kp = jax.random.split(key)
    raw_params = init_raw_params(kp, input_size, hidden_sizes, output_size)
    params = pack_params(raw_params, bn_eps=1e-5)

    # (batch, block_n): single-exact-block path, and multi-step grid with a
    # ragged tail (300 rows, 128-row tiles) to exercise partial-block masking.
    for batch, blk in [(32, 2048), (300, 128)]:
        x = jax.random.normal(jax.random.fold_in(kx, batch),
                              (batch, input_size), jnp.float32)
        out = mlp_forward(x, params, output_size, block_n=blk)
        out = jax.block_until_ready(out)
        assert out.shape == (batch, output_size)

        ref_bf = mlp_reference_folded(x, params, output_size)
        err_bf = float(jnp.max(jnp.abs(out - ref_bf)))
        assert jnp.allclose(out, ref_bf, atol=5e-3, rtol=5e-3), err_bf

        # Loose check against the full-f32 unfolded reference (validates the
        # BN fold / padding / bf16 pipeline end-to-end; slack is bf16 rounding).
        ref32 = mlp_reference_f32(x, raw_params)
        err32 = float(jnp.max(jnp.abs(out - ref32)))
        assert jnp.allclose(out, ref32, atol=1e-1, rtol=1e-1), err32

    print("KERNEL_OK")
</pallas_src>

<mosaic_0001>
module attributes {stable_mosaic.version = 11 : i64} {
  func.func @mlp_kernel(%arg0: i32, %arg1: memref<32x64xf32, #tpu.memory_space<vmem>>, %arg2: memref<64x128xbf16, #tpu.memory_space<vmem>>, %arg3: memref<1x128xf32, #tpu.memory_space<vmem>>, %arg4: memref<128x128xbf16, #tpu.memory_space<vmem>>, %arg5: memref<1x128xf32, #tpu.memory_space<vmem>>, %arg6: memref<8x128xbf16, #tpu.memory_space<vmem>>, %arg7: memref<1x1xf32, #tpu.memory_space<vmem>>, %arg8: memref<1x32xf32, #tpu.memory_space<vmem>>) attributes {dimension_semantics = [#tpu.dimension_semantics<parallel>], iteration_bounds = array<i64: 1>, scalar_prefetch = 0 : i64, scratch_operands = 0 : i64, tpu.core_type = #tpu.core_type<tc>, window_params = [{transform_indices = @transform_0, window_bounds = array<i64: 32, 64>}, {pipeline_mode = #tpu.pipeline_mode<synchronous>, transform_indices = @transform_1, window_bounds = array<i64: 64, 128>}, {pipeline_mode = #tpu.pipeline_mode<synchronous>, transform_indices = @transform_2, window_bounds = array<i64: 1, 128>}, {pipeline_mode = #tpu.pipeline_mode<synchronous>, transform_indices = @transform_3, window_bounds = array<i64: 128, 128>}, {pipeline_mode = #tpu.pipeline_mode<synchronous>, transform_indices = @transform_4, window_bounds = array<i64: 1, 128>}, {pipeline_mode = #tpu.pipeline_mode<synchronous>, transform_indices = @transform_5, window_bounds = array<i64: 8, 128>}, {pipeline_mode = #tpu.pipeline_mode<synchronous>, transform_indices = @transform_6, window_bounds = array<i64: 1, 1>}, {transform_indices = @transform_7, window_bounds = array<i64: 1, 32>}]} {
    %c0 = arith.constant 0 : index
    %c0_0 = arith.constant 0 : index
    %0 = vector.load %arg1[%c0, %c0_0] : memref<32x64xf32, #tpu.memory_space<vmem>>, vector<32x64xf32>
    %1 = arith.truncf %0 : vector<32x64xf32> to vector<32x64xbf16>
    %c0_1 = arith.constant 0 : index
    %c0_2 = arith.constant 0 : index
    %2 = vector.load %arg2[%c0_1, %c0_2] : memref<64x128xbf16, #tpu.memory_space<vmem>>, vector<64x128xbf16>
    %cst = arith.constant dense<0.000000e+00> : vector<32x128xf32>
    %3 = tpu.matmul %1, %2, %cst {dimension_numbers = #tpu.dot_dimension_numbers<[1], [0], [0], [1], [0, 0, 1, 1], [], []>} : vector<32x64xbf16>, vector<64x128xbf16>, vector<32x128xf32> -> vector<32x128xf32>
    %c0_3 = arith.constant 0 : index
    %c0_4 = arith.constant 0 : index
    %4 = vector.load %arg3[%c0_3, %c0_4] : memref<1x128xf32, #tpu.memory_space<vmem>>, vector<1x128xf32>
    %5 = vector.broadcast %4 : vector<1x128xf32> to vector<32x128xf32>
    %6 = arith.addf %3, %5 : vector<32x128xf32>
    %cst_5 = arith.constant 0.000000e+00 : f32
    %7 = vector.broadcast %cst_5 : f32 to vector<32x128xf32>
    %8 = arith.maximumf %6, %7 : vector<32x128xf32>
    %9 = arith.truncf %8 : vector<32x128xf32> to vector<32x128xbf16>
    %c0_6 = arith.constant 0 : index
    %c0_7 = arith.constant 0 : index
    %10 = vector.load %arg4[%c0_6, %c0_7] : memref<128x128xbf16, #tpu.memory_space<vmem>>, vector<128x128xbf16>
    %cst_8 = arith.constant dense<0.000000e+00> : vector<32x128xf32>
    %11 = tpu.matmul %9, %10, %cst_8 {dimension_numbers = #tpu.dot_dimension_numbers<[1], [0], [0], [1], [0, 0, 1, 1], [], []>} : vector<32x128xbf16>, vector<128x128xbf16>, vector<32x128xf32> -> vector<32x128xf32>
    %c0_9 = arith.constant 0 : index
    %c0_10 = arith.constant 0 : index
    %12 = vector.load %arg5[%c0_9, %c0_10] : memref<1x128xf32, #tpu.memory_space<vmem>>, vector<1x128xf32>
    %13 = vector.broadcast %12 : vector<1x128xf32> to vector<32x128xf32>
    %14 = arith.addf %11, %13 : vector<32x128xf32>
    %cst_11 = arith.constant 0.000000e+00 : f32
    %15 = vector.broadcast %cst_11 : f32 to vector<32x128xf32>
    %16 = arith.maximumf %14, %15 : vector<32x128xf32>
    %c0_12 = arith.constant 0 : index
    %c0_13 = arith.constant 0 : index
    %17 = vector.load %arg6[%c0_12, %c0_13] : memref<8x128xbf16, #tpu.memory_space<vmem>>, vector<8x128xbf16>
    %18 = arith.truncf %16 : vector<32x128xf32> to vector<32x128xbf16>
    %cst_14 = arith.constant dense<0.000000e+00> : vector<8x32xf32>
    %19 = tpu.matmul %17, %18, %cst_14 {dimension_numbers = #tpu.dot_dimension_numbers<[1], [1], [0], [0], [0, 0, 1, 0], [], []>} : vector<8x128xbf16>, vector<32x128xbf16>, vector<8x32xf32> -> vector<8x32xf32>
    %20 = vector.extract_strided_slice %19 {offsets = [0, 0], sizes = [1, 32], strides = [1, 1]} : vector<8x32xf32> to vector<1x32xf32>
    %c0_15 = arith.constant 0 : index
    %c0_16 = arith.constant 0 : index
    %21 = vector.load %arg7[%c0_15, %c0_16] : memref<1x1xf32, #tpu.memory_space<vmem>>, vector<1x1xf32>
    %22 = vector.broadcast %21 : vector<1x1xf32> to vector<1x32xf32>
    %23 = arith.addf %20, %22 : vector<1x32xf32>
    %c0_17 = arith.constant 0 : index
    %c0_18 = arith.constant 0 : index
    %24 = vector.load %arg8[%c0_17, %c0_18] : memref<1x32xf32, #tpu.memory_space<vmem>>, vector<1x32xf32>
    tpu.vector_store %arg8[%c0_17, %c0_18], %23 {strides = array<i32>} : memref<1x32xf32, #tpu.memory_space<vmem>>, vector<1x32xf32>,
    return
  }
  func.func @transform_0(%arg0: i32) -> (i32, i32) {
    %c0_i32 = arith.constant 0 : i32
    %c0_i32_0 = arith.constant 0 : i32
    return %arg0, %c0_i32 : i32, i32
  }
  func.func @transform_1(%arg0: i32) -> (i32, i32) {
    %c0_i32 = arith.constant 0 : i32
    %c0_i32_0 = arith.constant 0 : i32
    %c0_i32_1 = arith.constant 0 : i32
    return %c0_i32, %c0_i32_0 : i32, i32
  }
  func.func @transform_2(%arg0: i32) -> (i32, i32) {
    %c0_i32 = arith.constant 0 : i32
    %c0_i32_0 = arith.constant 0 : i32
    %c0_i32_1 = arith.constant 0 : i32
    return %c0_i32, %c0_i32_0 : i32, i32
  }
  func.func @transform_3(%arg0: i32) -> (i32, i32) {
    %c0_i32 = arith.constant 0 : i32
    %c0_i32_0 = arith.constant 0 : i32
    %c0_i32_1 = arith.constant 0 : i32
    return %c0_i32, %c0_i32_0 : i32, i32
  }
  func.func @transform_4(%arg0: i32) -> (i32, i32) {
    %c0_i32 = arith.constant 0 : i32
    %c0_i32_0 = arith.constant 0 : i32
    %c0_i32_1 = arith.constant 0 : i32
    return %c0_i32, %c0_i32_0 : i32, i32
  }
  func.func @transform_5(%arg0: i32) -> (i32, i32) {
    %c0_i32 = arith.constant 0 : i32
    %c0_i32_0 = arith.constant 0 : i32
    %c0_i32_1 = arith.constant 0 : i32
    return %c0_i32, %c0_i32_0 : i32, i32
  }
  func.func @transform_6(%arg0: i32) -> (i32, i32) {
    %c0_i32 = arith.constant 0 : i32
    %c0_i32_0 = arith.constant 0 : i32
    %c0_i32_1 = arith.constant 0 : i32
    return %c0_i32, %c0_i32_0 : i32, i32
  }
  func.func @transform_7(%arg0: i32) -> (i32, i32) {
    %c0_i32 = arith.constant 0 : i32
    %c0_i32_0 = arith.constant 0 : i32
    return %c0_i32, %arg0 : i32, i32
  }
}

</mosaic_0001>

<bundles_post_ra>
// kernel: tpu_custom_call.1
= control target key start
LH: loop header
LB: loop body
LE: loop exit
PB: predicated region body
PF: predicated region fallthrough
CT: control target
= control target key end

     0   :  { %s686_s0 = inlined_call_operand.hbm [shape: f32[32,64], index: 0, kind: input, shape index: {}]   ;;  %s687_s1 = inlined_call_operand.hbm [shape: bf16[64,128], index: 1, kind: input, shape index: {}]   ;;  %s688_s2 = inlined_call_operand.vmem [shape: f32[1,128], index: 2, kind: input, shape index: {}]   ;;  %s689_s3 = inlined_call_operand.hbm [shape: bf16[128,128], index: 3, kind: input, shape index: {}]   ;;  %s690_s4 = inlined_call_operand.vmem [shape: f32[1,128], index: 4, kind: input, shape index: {}]   ;;  %s691_s5 = inlined_call_operand.vmem [shape: bf16[8,128], index: 5, kind: input, shape index: {}]   ;;  %s692_s6 = inlined_call_operand.<no memory space> [shape: f32[1,1], index: 6, kind: input, shape index: {}]   ;;  %s693_s7 = inlined_call_operand.hbm [shape: f32[1,32], index: 7, kind: output, shape index: {}]  }
   0x1   :  { %v12_v0 = vstv %s692_s6 }
   0x2   :  { %13 = vst [vmem:[#allocation2] sm:$0x1] %v12_v0 }
   0x3   :  { %14 = vsyncpa [#allocation4], 0 }
   0x4   :  { %15 = vsyncpa [#allocation7], 0 }
   0x5   :  { %16 = vsyncpa [#allocation5], 0  ;;  %s567_s26 = smov [#allocation6]   ;;  %s473_s30 = scalar_lea.hbm %s687_s1, 512 }
   0x6   :  { %s34_s27 = sshll.u32 %s567_s26, 4  ;;  %p474_p0 = scmp.ne.s32.totalorder %s687_s1, %s473_s30  ;;  %s35_s27 = int_to_ptr.vmem [resolvable:$true] %s34_s27 }
   0x7   :  { %p477_p1 = scmp.lt.u32.totalorder %s473_s30, %s687_s1 }
   0x9   :  { %p479_p2 = pnand %p477_p1, %p474_p0 }
   0xb   :  { %482 = shalt.err (!%p479_p2)
}
   0xc   :  { %s483_s6 = scalar_lea.vmem %s35_s27, 512  ;;  %p488_p4 = scmp.lt.s32.totalorder %s35_s27, %s35_s27 }
   0xd   :  { %p484_p3 = scmp.ne.s32.totalorder %s35_s27, %s483_s6  ;;  %p489_p5 = scmp.lt.s32.totalorder %s483_s6, %s483_s6 }
   0xf   :  { %p490_p6 = por %p489_p5, %p488_p4 }
  0x11   :  { %p491_p7 = pnand %p490_p6, %p484_p3 }
  0x13   :  { %494 = shalt.err (!%p491_p7)
}
  0x14   :  { %s568_s12 = smov 64   ;;  %s569_s13 = smov 4  }
  0x15   :  { %40 = dma.hbm_to_vmem [thread:$0]  %s687_s1, 512, %s35_s27, [#allocation7], %s568_s12, %s568_s12, %s569_s13  }
  0x16   :  { %s570_s16 = smov [#allocation3]   ;;  %s495_s20 = scalar_lea.hbm %s686_s0, 512 }
  0x17   :  { %s22_s17 = sshll.u32 %s570_s16, 4  ;;  %p496_p8 = scmp.ne.s32.totalorder %s686_s0, %s495_s20  ;;  %s23_s17 = int_to_ptr.vmem [resolvable:$true] %s22_s17 }
  0x18   :  { %p499_p9 = scmp.lt.u32.totalorder %s495_s20, %s686_s0 }
  0x1a   :  { %p501_p10 = pnand %p499_p9, %p496_p8 }
  0x1c   :  { %504 = shalt.err (!%p501_p10)
}
  0x1d   :  { %s505_s25 = scalar_lea.vmem %s23_s17, 512  ;;  %p510_p12 = scmp.lt.s32.totalorder %s23_s17, %s23_s17 }
  0x1e   :  { %p506_p11 = scmp.ne.s32.totalorder %s23_s17, %s505_s25  ;;  %p511_p13 = scmp.lt.s32.totalorder %s505_s25, %s505_s25 }
  0x20   :  { %p512_p0 = por %p511_p13, %p510_p12 }
  0x22   :  { %p513_p1 = pnand %p512_p0, %p506_p11 }
  0x24   :  { %516 = shalt.err (!%p513_p1)
}
  0x25   :  { %s571_s1 = smov 128   ;;  %s572_s26 = smov 8  }
  0x26   :  { %28 = dma.hbm_to_vmem [thread:$0]  %s686_s0, 512, %s23_s17, [#allocation4], %s571_s1, %s571_s1, %s572_s26  }
  0x27   :  { %s573_s29 = smov [#allocation8]   ;;  %s517_s10 = scalar_lea.hbm %s689_s3, 1024 }
  0x28   :  { %s48_s30 = sshll.u32 %s573_s29, 4  ;;  %p518_p2 = scmp.ne.s32.totalorder %s689_s3, %s517_s10  ;;  %s49_s30 = int_to_ptr.vmem [resolvable:$true] %s48_s30 }
  0x29   :  { %p521_p3 = scmp.lt.u32.totalorder %s517_s10, %s689_s3 }
  0x2b   :  { %p523_p4 = pnand %p521_p3, %p518_p2 }
  0x2d   :  { %526 = shalt.err (!%p523_p4)
}
  0x2e   :  { %s527_s16 = scalar_lea.vmem %s49_s30, 1024  ;;  %p532_p6 = scmp.lt.s32.totalorder %s49_s30, %s49_s30 }
  0x2f   :  { %p528_p5 = scmp.ne.s32.totalorder %s49_s30, %s527_s16  ;;  %p533_p7 = scmp.lt.s32.totalorder %s527_s16, %s527_s16 }
  0x31   :  { %p534_p8 = por %p533_p7, %p532_p6 }
  0x33   :  { %p535_p9 = pnand %p534_p8, %p528_p5 }
  0x35   :  { %538 = shalt.err (!%p535_p9)
}
  0x36   :  { %54 = dma.hbm_to_vmem [thread:$0]  %s689_s3, 1024, %s49_s30, [#allocation7], %s568_s12, %s568_s12, %s569_s13  }
  0x37   :  { %561 = dma.done.wait [#allocation4], 512  }
  0x38   :  { %562 = vsyncadd [#allocation4], 4294966784 }
  0x39   :  { %563 = dma.done.wait [#allocation7], 1536  }
  0x3a   :  { %564 = vsyncadd [#allocation7], 4294965760  ;;  %v461_v1 = vld [vmem:[#allocation6] sm:$0xff]   ;;  %v462_v2 = vld [vmem:[#allocation6 + $0x8] sm:$0xff]   ;;  %vm116_vm0 = vcmask 523264   ;;  %v574_v34 = vmov 0.0   ;;  %v351_v53 = vlaneseq }
  0x3b   :  { %409 = vmatprep.subr.bf16.mxu0 %v461_v1  ;;  %v463_v3 = vld [vmem:[#allocation6 + $0x10] sm:$0xff]   ;;  %v71_v4 = vld [vmem:[#allocation3] sm:$0xff]  ;;  %v72_v5 = vld [vmem:[#allocation3 + $0x8] sm:$0xff]  ;;  %vm575_vm1 = vmmov 0   ;;  %v576_v36 = vmov 0   ;;  %vm356_vm2 = vcmask 253952  }
  0x3c   :  { %410 = vmatpush3.bf16.msra.mxu0 %v461_v1  ;;  %v75_v6 = vpack.c.bf16 %v72_v5, %v71_v4  ;;  %v465_v7 = vld [vmem:[#allocation8] sm:$0xff]   ;;  %v466_v8 = vld [vmem:[#allocation8 + $0x8] sm:$0xff]   ;;  %v464_v9 = vld [vmem:[#allocation6 + $0x18] sm:$0xff]   ;;  %460 = vset.pattern.permute.xlu0 %v576_v36  ;;  %v352_v54 = vshrl.u32 %v351_v53, 7 }
  0x3d   :  { %411 = vmatprep.subr.bf16.mxu0 %v462_v2  ;;  %421 = vmatprep.subr.bf16.mxu1 %v465_v7  ;;  %v73_v10 = vld [vmem:[#allocation3 + $0x10] sm:$0xff]  ;;  %v74_v12 = vld [vmem:[#allocation3 + $0x18] sm:$0xff]  ;;  %v469_v15 = vld [vmem:[#allocation8 + $0x20] sm:$0xff]  }
  0x3e   :  { %417 = vmatprep.mubr.msk.bf16.mxu0 %vm116_vm0, %v75_v6  ;;  %422 = vmatpush3.bf16.msra.mxu1 %v465_v7  ;;  %v467_v11 = vld [vmem:[#allocation8 + $0x10] sm:$0xff]   ;;  %v76_v13 = vpack.c.bf16 %v74_v12, %v73_v10  ;;  %v468_v14 = vld [vmem:[#allocation8 + $0x18] sm:$0xff]   ;;  %v470_v16 = vld [vmem:[#allocation8 + $0x28] sm:$0xff]   ;;  %v353_v55 = vsub.s32 0, %v352_v54 }
  0x3f   :  { %423 = vmatprep.subr.bf16.mxu1 %v466_v8  ;;  %v471_v17 = vld [vmem:[#allocation8 + $0x30] sm:$0xff]   ;;  %v472_v18 = vld [vmem:[#allocation8 + $0x38] sm:$0xff]  }
  0x40   :  { %412 = vmatpush3.bf16.msra.mxu0 %v462_v2  ;;  %v374_v19 = vld [vmem:[%s688_s2] ss:$0 sm:$0xff] }
  0x41   :  { %413 = vmatprep.subr.bf16.mxu0 %v463_v3  ;;  %v345_v35 = vld [vmem:[#allocation2] sm:$0x1] }
  0x42   :  { %424 = vmatpush3.bf16.msra.mxu1 %v466_v8  ;;  %348 = vperm.xlu0 %460, %v345_v35   ;;  %v381_v37 = vld [vmem:[%s690_s4] ss:$0 sm:$0xff]  ;;  %s577_s4 = smov [#allocation9]  }
  0x43   :  { %425 = vmatprep.subr.bf16.mxu1 %v467_v11  ;;  %v302_v52 = vld [vmem:[%s691_s5] sm:$0xf]  ;;  %s364_s20 = sshll.u32 %s577_s4, 4  ;;  %s365_s20 = int_to_ptr.vmem [resolvable:$true] %s364_s20 }
  0x44   :  { %414 = vmatpush3.bf16.msra.mxu0 %v463_v3  ;;  %s539_s21 = scalar_lea.vmem %s365_s20, 16  ;;  %s543_s22 = scalar_lea.vmem %s365_s20, 32 }
  0x45   :  { %415 = vmatprep.subr.bf16.mxu0 %v464_v9  ;;  %p540_p10 = scmp.ne.s32.totalorder %s365_s20, %s539_s21  ;;  %p544_p11 = scmp.lt.s32.totalorder %s365_s20, %s365_s20 }
  0x46   :  { %426 = vmatpush3.bf16.msra.mxu1 %v467_v11  ;;  %p545_p12 = scmp.lt.s32.totalorder %s543_s22, %s539_s21 }
  0x47   :  { %427 = vmatprep.subr.bf16.mxu1 %v468_v14 }
  0x48   :  { %416 = vmatpush3.bf16.msra.mxu0 %v464_v9  ;;  %p546_p13 = por %p545_p12, %p544_p11 }
  0x49   :  { %441 = vmatprep.subr.bf16.mxu0 %v574_v34 }
  0x4a   :  { %428 = vmatpush3.bf16.msra.mxu1 %v468_v14  ;;  %p547_p0 = pnand %p546_p13, %p540_p10 }
  0x4b   :  { %418 = vmatmul.mubr.msk.bf16.vlgmr.msra.gmra.mrb[0].mxu0 %vm116_vm0, %v76_v13  ;;  %429 = vmatprep.subr.bf16.mxu1 %v469_v15 }
  0x4c   :  { %445 = vmatprep.mubr.msk.bf16.mxu0 %vm575_vm1, %v574_v34 }
  0x4e   :  { %430 = vmatpush3.bf16.msra.mxu1 %v469_v15 }
  0x4f   :  { %431 = vmatprep.subr.bf16.mxu1 %v470_v16 }
  0x52   :  { %432 = vmatpush3.bf16.msra.mxu1 %v470_v16 }
  0x53   :  { %433 = vmatprep.subr.bf16.mxu1 %v471_v17 }
  0x56   :  { %434 = vmatpush3.bf16.msra.mxu1 %v471_v17 }
  0x57   :  { %435 = vmatprep.subr.bf16.mxu1 %v472_v18 }
  0x5a   :  { %436 = vmatpush3.bf16.msra.mxu1 %v472_v18 }
  0xc1   :  { %v349_v56 = vpop.permute.xlu0 %348 }
  0xc2   :  { %v354_v57 = vrot.slane %v349_v56, %v353_v55 }
 0x11e   :  { %v419_v20 = vpop.f32.mrb[0].mxu0 }
 0x11f   :  { %v166_v21 = vadd.f32 %v419_v20, %v374_v19  ;;  %v157_v22 = vpop.f32.mrb[1].mxu0 }
 0x120   :  { %v158_v23 = vadd.f32 %v374_v19, %v157_v22  ;;  %v420_v24 = vpop.f32.mrb[2].mxu0 }
 0x121   :  { %v169_v25 = vadd.f32 %v420_v24, %v374_v19  ;;  %v160_v26 = vpop.f32.mrb[3].mxu0  ;;  %v174_v28 = vmax.f32 %v166_v21, 0.0 }
 0x122   :  { %v161_v27 = vadd.f32 %v374_v19, %v160_v26  ;;  %v172_v30 = vmax.f32 %v158_v23, 0.0 }
 0x123   :  { %v175_v29 = vmax.f32 %v169_v25, 0.0 }
 0x124   :  { %v173_v31 = vmax.f32 %v161_v27, 0.0 }
 0x125   :  { %v177_v32 = vpack.c.bf16 %v175_v29, %v174_v28 }
 0x126   :  { %v176_v33 = vpack.c.bf16 %v173_v31, %v172_v30 }
 0x128   :  { %437 = vmatprep.mubr.bf16.mxu1 %v176_v33 }
 0x129   :  { %438 = vmatmul.mubr.bf16.vlgmr.msra.gmra.mrb[0].mxu1 %v177_v32 }
 0x1fc   :  { %v439_v38 = vpop.f32.mrb[0].mxu1 }
 0x1fd   :  { %v292_v39 = vadd.f32 %v439_v38, %v381_v37  ;;  %v283_v40 = vpop.f32.mrb[1].mxu1 }
 0x1fe   :  { %v284_v41 = vadd.f32 %v381_v37, %v283_v40  ;;  %v440_v42 = vpop.f32.mrb[2].mxu1 }
 0x1ff   :  { %v295_v43 = vadd.f32 %v440_v42, %v381_v37  ;;  %v286_v44 = vpop.f32.mrb[3].mxu1  ;;  %v300_v46 = vmax.f32 %v292_v39, 0.0 }
 0x200   :  { %v287_v45 = vadd.f32 %v381_v37, %v286_v44  ;;  %v298_v48 = vmax.f32 %v284_v41, 0.0 }
 0x201   :  { %v301_v47 = vmax.f32 %v295_v43, 0.0 }
 0x202   :  { %v299_v49 = vmax.f32 %v287_v45, 0.0 }
 0x203   :  { %v304_v50 = vpack.c.bf16 %v301_v47, %v300_v46 }
 0x204   :  { %v303_v51 = vpack.c.bf16 %v299_v49, %v298_v48 }
 0x206   :  { %442 = vmatpush3.bf16.xpose.msra.mxu0 %v303_v51 }
 0x207   :  { %443 = vmatprep.subr.bf16.mxu0 %v574_v34 }
 0x20e   :  { %444 = vmatpush3.bf16.xpose.msra.mxu0 %v304_v50 }
 0x215   :  { %446 = vmatmul.mubr.bf16.vlgmr.msra.gmra.mrb[4].mxu0 %v302_v52 }
 0x2e8   :  { %v339_v58 = vpop.f32.mrb[4].mxu0 }
 0x2e9   :  { %v355_v59 = vadd.f32 %v354_v57, %v339_v58  ;;  %v447_v60 = vpop.f32.mrb[5].mxu0 }
 0x2ea   :  { %v342_v61 = vpop.f32.mrb[6].mxu0 }
 0x2eb   :  { %v448_v62 = vpop.f32.mrb[7].mxu0  ;;  %357 = vst.msk [vmem:[#allocation9] sm:$0x1] %vm356_vm2, %v355_v59 }
 0x2ec   :  { %550 = shalt.err (!%p547_p0)
}
 0x2ed   :  { %s551_s24 = scalar_lea.hbm %s693_s7, 16 }
 0x2ee   :  { %p552_p1 = scmp.ne.s32.totalorder %s693_s7, %s551_s24  ;;  %p555_p2 = scmp.lt.u32.totalorder %s551_s24, %s693_s7 }
 0x2f0   :  { %p557_p3 = pnand %p555_p2, %p552_p1 }
 0x2f2   :  { %560 = shalt.err (!%p557_p3)
}
 0x2f3   :  { %367 = dma.vmem_to_hbm [thread:$0]  %s365_s20, 16, %s693_s7, [#allocation5]  }
 0x2f4   :  { %565 = dma.done.wait [#allocation5], 16  }
 0x2f5   :  { %566 = vsyncadd [#allocation5], 4294967280 }
 0x2f6   :  { %371 = vsyncpa [#allocation4], 1 }
 0x2f7   :  { %372 = vsyncpa [#allocation7], 1 }
 0x2f8   :  { %373 = vsyncpa [#allocation5], 1 }

</bundles_post_ra>
